<compile_context>
chip_gen: v6e
topology: v6e:2x2x1
jax: 0.10.0
libtpu: 0.0.40
codegen_flags: <defaults>
</compile_context>

<pallas_src>
import jax
import jax.numpy as jnp
from jax.experimental import pallas as pl
from jax.experimental.pallas import tpu as pltpu


def _linear_softmax_kernel(w_ref, b_ref, xt_ref, ot_ref):
    # w_ref: SMEM (3, 4)    b_ref: SMEM (3,)
    # xt_ref: VMEM (4, Bt)  ot_ref: VMEM (3, Bt)
    x0 = xt_ref[0:1, :]
    x1 = xt_ref[1:2, :]
    x2 = xt_ref[2:3, :]
    x3 = xt_ref[3:4, :]

    # logits^T[c, :] = sum_k w[c, k] * x^T[k, :] + b[c]   (12 VPU madds, no MXU)
    logits = []
    for c in range(3):
        lc = (x0 * w_ref[c, 0] + x1 * w_ref[c, 1]
              + x2 * w_ref[c, 2] + x3 * w_ref[c, 3] + b_ref[c])
        logits.append(lc)

    # Numerically stable softmax over the 3 classes, fully unrolled/elementwise.
    m = jnp.maximum(jnp.maximum(logits[0], logits[1]), logits[2])
    e0 = jnp.exp(logits[0] - m)
    e1 = jnp.exp(logits[1] - m)
    e2 = jnp.exp(logits[2] - m)
    # Exact reciprocal: rows must sum to 1 (approx EUP rcp is not tight enough).
    inv = pl.reciprocal(e0 + e1 + e2, approx=False)
    ot_ref[0:1, :] = e0 * inv
    ot_ref[1:2, :] = e1 * inv
    ot_ref[2:3, :] = e2 * inv


_SMEM_SPEC = pl.BlockSpec(memory_space=pltpu.MemorySpace.SMEM)
_VMEM_SPEC = pl.BlockSpec(memory_space=pltpu.MemorySpace.VMEM)

_DEFAULT_BATCH_TILE = 256 * 1024        # lanes per grid step (HBM-roofline sized)
_DEFAULT_SMALL_BATCH_MAX = 64 * 1024    # whole problem comfortably VMEM-resident
_VMEM_LIMIT_BYTES = 48 * 1024 * 1024    # > 2*(8+8)*4*bt sublane-padded, < v7x 64 MiB


def _round_up(v, m):
    return ((v + m - 1) // m) * m


def _forward_small(w, b, xt):
    # Gridless call: whole (4, B) / (3, B) arrays as single VMEM-resident
    # blocks -> no pipeline prologue/epilogue or per-step bookkeeping.
    B = xt.shape[1]
    return pl.pallas_call(
        _linear_softmax_kernel,
        out_shape=jax.ShapeDtypeStruct((3, B), jnp.float32),
        in_specs=[_SMEM_SPEC, _SMEM_SPEC, _VMEM_SPEC],
        out_specs=_VMEM_SPEC,
    )(w, b, xt)


def _forward_tiled(w, b, xt, batch_tile, n_tiles):
    # Batch-tiled, auto-pipelined HBM streaming; w/b stay resident in SMEM.
    # No padding: the ragged last block's out-of-bounds writes are masked by
    # Pallas, and the computation is purely per-column elementwise, so garbage
    # in the padded read lanes never reaches valid output columns.
    B = xt.shape[1]
    return pl.pallas_call(
        _linear_softmax_kernel,
        out_shape=jax.ShapeDtypeStruct((3, B), jnp.float32),
        grid=(n_tiles,),
        in_specs=[
            _SMEM_SPEC,
            _SMEM_SPEC,
            pl.BlockSpec((4, batch_tile), lambda i: (0, i)),
        ],
        out_specs=pl.BlockSpec((3, batch_tile), lambda i: (0, i)),
        compiler_params=pltpu.CompilerParams(
            # Batch tiles are independent -> shard across both TCs on v7x.
            dimension_semantics=("parallel",),
            vmem_limit_bytes=_VMEM_LIMIT_BYTES,
        ),
    )(w, b, xt)


def linear_classification_forward_t(xt, w, b, *,
                                    batch_tile=_DEFAULT_BATCH_TILE,
                                    small_batch_max=_DEFAULT_SMALL_BATCH_MAX):
    """Transposed-layout entry point (no wrapper transposes).

    xt: (4, B) f32 (batch on the lane axis), w: (3, 4) f32, b: (3,) f32
    -> (3, B) f32 class probabilities.
    """
    B = xt.shape[1]
    xt = xt.astype(jnp.float32)
    w = w.astype(jnp.float32)
    b = b.astype(jnp.float32)

    if B <= small_batch_max:
        return _forward_small(w, b, xt)

    n_tiles = pl.cdiv(B, batch_tile)
    if n_tiles < 2:
        # Keep >= 2 grid steps so "parallel" semantics can split across the
        # two TensorCores on v7x; lanes stay a multiple of 128.
        batch_tile = max(128, _round_up(pl.cdiv(B, 2), 128))
        n_tiles = pl.cdiv(B, batch_tile)
    return _forward_tiled(w, b, xt, batch_tile, n_tiles)


def linear_classification_forward(x, w, b, **kwargs):
    """PyTorch-contract wrapper: x (B, 4) f32 -> (B, 3) f32 probabilities.

    Note: the two jnp.transpose passes below roughly triple HBM traffic for
    this memory-bound op; callers that control their own layout should use
    linear_classification_forward_t with (4, B) inputs / (3, B) outputs.
    """
    xt = jnp.transpose(x.astype(jnp.float32))   # (4, B): batch on the lane axis
    yt = linear_classification_forward_t(xt, w, b, **kwargs)
    return jnp.transpose(yt)                    # back to (B, 3)


def init_params(key):
    """Deterministic init matching PyTorch Linear(4, 3) default init ranges."""
    k_w, k_b = jax.random.split(key)
    bound = 1.0 / jnp.sqrt(4.0)  # 1/sqrt(fan_in)
    w = jax.random.uniform(k_w, (3, 4), jnp.float32, -bound, bound)  # (out, in)
    b = jax.random.uniform(k_b, (3,), jnp.float32, -bound, bound)
    return w, b


def _reference(x, w, b):
    return jax.nn.softmax(x @ w.T + b, axis=-1)


if __name__ == "__main__":
    key = jax.random.PRNGKey(0)
    k_x, k_x2, k_p = jax.random.split(key, 3)
    w, b = init_params(k_p)  # w: (3, 4), b: (3,)

    # Small-batch (iris-like) path: gridless kernel call via the PyTorch API.
    B_small = 8
    x_small = jax.random.normal(k_x, (B_small, 4), dtype=jnp.float32)
    y_small = jax.block_until_ready(linear_classification_forward(x_small, w, b))
    assert y_small.shape == (B_small, 3)
    assert bool(jnp.max(jnp.abs(y_small - _reference(x_small, w, b))) < 2e-3)
    assert bool(jnp.max(jnp.abs(jnp.sum(y_small, axis=-1) - 1.0)) < 1e-3)

    # Tiled path (forced with small_batch_max=0): grid of 2 tiles with a
    # ragged, masked last block (2000 = 1024 + 976), transposed-layout API.
    B_big = 2000
    x_big = jax.random.normal(k_x2, (B_big, 4), dtype=jnp.float32)
    yt_big = jax.block_until_ready(
        linear_classification_forward_t(jnp.transpose(x_big), w, b,
                                        small_batch_max=0))
    y_big = jnp.transpose(yt_big)
    assert y_big.shape == (B_big, 3)
    assert bool(jnp.max(jnp.abs(y_big - _reference(x_big, w, b))) < 2e-3)
    assert bool(jnp.max(jnp.abs(jnp.sum(y_big, axis=-1) - 1.0)) < 1e-3)

    print("KERNEL_OK")
</pallas_src>

<mosaic_0001>
module attributes {stable_mosaic.version = 11 : i64} {
  func.func @_linear_softmax_kernel(%arg0: memref<3x4xf32, #tpu.memory_space<smem>>, %arg1: memref<3xf32, #tpu.memory_space<smem>>, %arg2: memref<4x8xf32, #tpu.memory_space<vmem>>, %arg3: memref<3x8xf32, #tpu.memory_space<vmem>>) attributes {dimension_semantics = [], scalar_prefetch = 0 : i64, scratch_operands = 0 : i64, tpu.core_type = #tpu.core_type<tc>} {
    %c0 = arith.constant 0 : index
    %c0_0 = arith.constant 0 : index
    %0 = vector.load %arg2[%c0, %c0_0] : memref<4x8xf32, #tpu.memory_space<vmem>>, vector<1x8xf32>
    %c1 = arith.constant 1 : index
    %c0_1 = arith.constant 0 : index
    %1 = vector.load %arg2[%c1, %c0_1] : memref<4x8xf32, #tpu.memory_space<vmem>>, vector<1x8xf32>
    %c2 = arith.constant 2 : index
    %c0_2 = arith.constant 0 : index
    %2 = vector.load %arg2[%c2, %c0_2] : memref<4x8xf32, #tpu.memory_space<vmem>>, vector<1x8xf32>
    %c3 = arith.constant 3 : index
    %c0_3 = arith.constant 0 : index
    %3 = vector.load %arg2[%c3, %c0_3] : memref<4x8xf32, #tpu.memory_space<vmem>>, vector<1x8xf32>
    %c0_4 = arith.constant 0 : index
    %c0_5 = arith.constant 0 : index
    %4 = memref.load %arg0[%c0_4, %c0_5] : memref<3x4xf32, #tpu.memory_space<smem>>
    %5 = vector.broadcast %4 : f32 to vector<1x8xf32>
    %6 = arith.mulf %0, %5 : vector<1x8xf32>
    %c0_6 = arith.constant 0 : index
    %c1_7 = arith.constant 1 : index
    %7 = memref.load %arg0[%c0_6, %c1_7] : memref<3x4xf32, #tpu.memory_space<smem>>
    %8 = vector.broadcast %7 : f32 to vector<1x8xf32>
    %9 = arith.mulf %1, %8 : vector<1x8xf32>
    %10 = arith.addf %6, %9 : vector<1x8xf32>
    %c0_8 = arith.constant 0 : index
    %c2_9 = arith.constant 2 : index
    %11 = memref.load %arg0[%c0_8, %c2_9] : memref<3x4xf32, #tpu.memory_space<smem>>
    %12 = vector.broadcast %11 : f32 to vector<1x8xf32>
    %13 = arith.mulf %2, %12 : vector<1x8xf32>
    %14 = arith.addf %10, %13 : vector<1x8xf32>
    %c0_10 = arith.constant 0 : index
    %c3_11 = arith.constant 3 : index
    %15 = memref.load %arg0[%c0_10, %c3_11] : memref<3x4xf32, #tpu.memory_space<smem>>
    %16 = vector.broadcast %15 : f32 to vector<1x8xf32>
    %17 = arith.mulf %3, %16 : vector<1x8xf32>
    %18 = arith.addf %14, %17 : vector<1x8xf32>
    %c0_12 = arith.constant 0 : index
    %19 = memref.load %arg1[%c0_12] : memref<3xf32, #tpu.memory_space<smem>>
    %20 = vector.broadcast %19 : f32 to vector<1x8xf32>
    %21 = arith.addf %18, %20 : vector<1x8xf32>
    %c1_13 = arith.constant 1 : index
    %c0_14 = arith.constant 0 : index
    %22 = memref.load %arg0[%c1_13, %c0_14] : memref<3x4xf32, #tpu.memory_space<smem>>
    %23 = vector.broadcast %22 : f32 to vector<1x8xf32>
    %24 = arith.mulf %0, %23 : vector<1x8xf32>
    %c1_15 = arith.constant 1 : index
    %c1_16 = arith.constant 1 : index
    %25 = memref.load %arg0[%c1_15, %c1_16] : memref<3x4xf32, #tpu.memory_space<smem>>
    %26 = vector.broadcast %25 : f32 to vector<1x8xf32>
    %27 = arith.mulf %1, %26 : vector<1x8xf32>
    %28 = arith.addf %24, %27 : vector<1x8xf32>
    %c1_17 = arith.constant 1 : index
    %c2_18 = arith.constant 2 : index
    %29 = memref.load %arg0[%c1_17, %c2_18] : memref<3x4xf32, #tpu.memory_space<smem>>
    %30 = vector.broadcast %29 : f32 to vector<1x8xf32>
    %31 = arith.mulf %2, %30 : vector<1x8xf32>
    %32 = arith.addf %28, %31 : vector<1x8xf32>
    %c1_19 = arith.constant 1 : index
    %c3_20 = arith.constant 3 : index
    %33 = memref.load %arg0[%c1_19, %c3_20] : memref<3x4xf32, #tpu.memory_space<smem>>
    %34 = vector.broadcast %33 : f32 to vector<1x8xf32>
    %35 = arith.mulf %3, %34 : vector<1x8xf32>
    %36 = arith.addf %32, %35 : vector<1x8xf32>
    %c1_21 = arith.constant 1 : index
    %37 = memref.load %arg1[%c1_21] : memref<3xf32, #tpu.memory_space<smem>>
    %38 = vector.broadcast %37 : f32 to vector<1x8xf32>
    %39 = arith.addf %36, %38 : vector<1x8xf32>
    %c2_22 = arith.constant 2 : index
    %c0_23 = arith.constant 0 : index
    %40 = memref.load %arg0[%c2_22, %c0_23] : memref<3x4xf32, #tpu.memory_space<smem>>
    %41 = vector.broadcast %40 : f32 to vector<1x8xf32>
    %42 = arith.mulf %0, %41 : vector<1x8xf32>
    %c2_24 = arith.constant 2 : index
    %c1_25 = arith.constant 1 : index
    %43 = memref.load %arg0[%c2_24, %c1_25] : memref<3x4xf32, #tpu.memory_space<smem>>
    %44 = vector.broadcast %43 : f32 to vector<1x8xf32>
    %45 = arith.mulf %1, %44 : vector<1x8xf32>
    %46 = arith.addf %42, %45 : vector<1x8xf32>
    %c2_26 = arith.constant 2 : index
    %c2_27 = arith.constant 2 : index
    %47 = memref.load %arg0[%c2_26, %c2_27] : memref<3x4xf32, #tpu.memory_space<smem>>
    %48 = vector.broadcast %47 : f32 to vector<1x8xf32>
    %49 = arith.mulf %2, %48 : vector<1x8xf32>
    %50 = arith.addf %46, %49 : vector<1x8xf32>
    %c2_28 = arith.constant 2 : index
    %c3_29 = arith.constant 3 : index
    %51 = memref.load %arg0[%c2_28, %c3_29] : memref<3x4xf32, #tpu.memory_space<smem>>
    %52 = vector.broadcast %51 : f32 to vector<1x8xf32>
    %53 = arith.mulf %3, %52 : vector<1x8xf32>
    %54 = arith.addf %50, %53 : vector<1x8xf32>
    %c2_30 = arith.constant 2 : index
    %55 = memref.load %arg1[%c2_30] : memref<3xf32, #tpu.memory_space<smem>>
    %56 = vector.broadcast %55 : f32 to vector<1x8xf32>
    %57 = arith.addf %54, %56 : vector<1x8xf32>
    %58 = arith.maximumf %21, %39 : vector<1x8xf32>
    %59 = arith.maximumf %58, %57 : vector<1x8xf32>
    %60 = arith.subf %21, %59 : vector<1x8xf32>
    %61 = math.exp %60 : vector<1x8xf32>
    %62 = arith.subf %39, %59 : vector<1x8xf32>
    %63 = math.exp %62 : vector<1x8xf32>
    %64 = arith.subf %57, %59 : vector<1x8xf32>
    %65 = math.exp %64 : vector<1x8xf32>
    %66 = arith.addf %61, %63 : vector<1x8xf32>
    %67 = arith.addf %66, %65 : vector<1x8xf32>
    %68 = tpu.reciprocal %67 : vector<1x8xf32> -> vector<1x8xf32>
    %69 = arith.mulf %61, %68 : vector<1x8xf32>
    %c0_31 = arith.constant 0 : index
    %c0_32 = arith.constant 0 : index
    %70 = vector.load %arg3[%c0_31, %c0_32] : memref<3x8xf32, #tpu.memory_space<vmem>>, vector<1x8xf32>
    tpu.vector_store %arg3[%c0_31, %c0_32], %69 {strides = array<i32>} : memref<3x8xf32, #tpu.memory_space<vmem>>, vector<1x8xf32>,
    %71 = arith.mulf %63, %68 : vector<1x8xf32>
    %c1_33 = arith.constant 1 : index
    %c0_34 = arith.constant 0 : index
    %72 = vector.load %arg3[%c1_33, %c0_34] : memref<3x8xf32, #tpu.memory_space<vmem>>, vector<1x8xf32>
    tpu.vector_store %arg3[%c1_33, %c0_34], %71 {strides = array<i32>} : memref<3x8xf32, #tpu.memory_space<vmem>>, vector<1x8xf32>,
    %73 = arith.mulf %65, %68 : vector<1x8xf32>
    %c2_35 = arith.constant 2 : index
    %c0_36 = arith.constant 0 : index
    %74 = vector.load %arg3[%c2_35, %c0_36] : memref<3x8xf32, #tpu.memory_space<vmem>>, vector<1x8xf32>
    tpu.vector_store %arg3[%c2_35, %c0_36], %73 {strides = array<i32>} : memref<3x8xf32, #tpu.memory_space<vmem>>, vector<1x8xf32>,
    return
  }
}

</mosaic_0001>

<bundles_post_ra>
// kernel: tpu_custom_call.1
= control target key start
LH: loop header
LB: loop body
LE: loop exit
PB: predicated region body
PF: predicated region fallthrough
CT: control target
= control target key end

     0   :  { %8 = vsyncpa [#allocation5], 0  ;;  %s281_s0 = inlined_call_operand.hbm [shape: f32[3,4], index: 0, kind: input, shape index: {}]   ;;  %s282_s1 = inlined_call_operand.vmem [shape: f32[3], index: 1, kind: input, shape index: {}]   ;;  %s283_s2 = inlined_call_operand.hbm [shape: f32[4,8], index: 2, kind: input, shape index: {}]   ;;  %s284_s3 = inlined_call_operand.hbm [shape: f32[3,8], index: 3, kind: output, shape index: {}]  }
   0x1   :  { %9 = vsyncpa [#allocation6], 0 }
   0x2   :  { %10 = vsyncpa [#allocation3], 0 }
   0x3   :  { %11 = vsyncpa [#allocation4], 0  ;;  %s26_s14 = sshll.u32 %s282_s1, 4  ;;  %s239_s15 = smov [#allocation2]   ;;  %s27_s14 = int_to_ptr.vmem [resolvable:$true] %s26_s14 }
   0x4   :  { %19 = dma.hbm_to_smem %s281_s0, 64, %s239_s15, [#allocation5]  }
   0x5   :  { %s179_s18 = scalar_lea.vmem %s27_s14, 16  ;;  %p184_p1 = scmp.lt.s32.totalorder %s27_s14, %s27_s14 }
   0x6   :  { %p180_p0 = scmp.ne.s32.totalorder %s27_s14, %s179_s18  ;;  %p185_p2 = scmp.lt.s32.totalorder %s179_s18, %s179_s18 }
   0x8   :  { %p186_p3 = por %p185_p2, %p184_p1 }
   0xa   :  { %p187_p4 = pnand %p186_p3, %p180_p0 }
   0xc   :  { %190 = shalt.err (!%p187_p4)
}
   0xd   :  { %s240_s19 = smov [#allocation7]   ;;  %s241_s20 = smov [#allocation8]  }
   0xe   :  { %29 = dma.vmem_to_smem %s27_s14, 16, %s240_s19, [#allocation6]  }
   0xf   :  { %s36_s21 = sshll.u32 %s241_s20, 4  ;;  %s37_s21 = int_to_ptr.vmem [resolvable:$true] %s36_s21 }
  0x10   :  { %s199_s22 = scalar_lea.vmem %s37_s21, 64  ;;  %p204_p6 = scmp.lt.s32.totalorder %s37_s21, %s37_s21 }
  0x11   :  { %p200_p5 = scmp.ne.s32.totalorder %s37_s21, %s199_s22  ;;  %p205_p7 = scmp.lt.s32.totalorder %s199_s22, %s199_s22 }
  0x13   :  { %p206_p8 = por %p205_p7, %p204_p6 }
  0x15   :  { %p207_p9 = pnand %p206_p8, %p200_p5 }
  0x17   :  { %210 = shalt.err (!%p207_p9)
}
  0x18   :  { %39 = dma.hbm_to_vmem [thread:$0]  %s283_s2, 64, %s37_s21, [#allocation3]  }
  0x19   :  { %231 = dma.done.wait [#allocation5], 64  }
  0x1a   :  { %232 = vsyncadd [#allocation5], 4294967232 }
  0x1b   :  { %233 = dma.done.wait [#allocation6], 16  }
  0x1c   :  { %234 = vsyncadd [#allocation6], 4294967280 }
  0x1d   :  { %235 = dma.done.wait [#allocation3], 64  }
  0x1e   :  { %236 = vsyncadd [#allocation3], 4294967232 }
  0x1f   :  { %49 = sfence }
  0x20   :  { %s54_s23 = sld [smem:[#allocation2]]  ;;  %v50_v0 = vld [vmem:[#allocation8] sm:$0x1]  ;;  %v51_v1 = vld [vmem:[#allocation8 + $0x1] sm:$0x1]  ;;  %s242_s10 = smov [#allocation9]  }
  0x21   :  { %s146_s24 = sld [smem:[#allocation2 + $0x1]]  ;;  %v52_v2 = vld [vmem:[#allocation8 + $0x2] sm:$0x1]  ;;  %v53_v8 = vld [vmem:[#allocation8 + $0x3] sm:$0x1]  ;;  %s135_s11 = sshll.u32 %s242_s10, 4  ;;  %s136_s11 = int_to_ptr.vmem [resolvable:$true] %s135_s11 }
  0x22   :  { %s147_s25 = sld [smem:[#allocation2 + $0x2]]  ;;  %vm123_vm0 = vcmask 57344   ;;  %s211_s12 = scalar_lea.vmem %s136_s11, 64 }
  0x23   :  { %s148_s26 = sld [smem:[#allocation2 + $0x3]]  ;;  %p212_p10 = scmp.ne.s32.totalorder %s136_s11, %s211_s12 }
  0x24   :  { %s272_s27 = sld [smem:[#allocation7]]  ;;  %p216_p11 = scmp.lt.s32.totalorder %s136_s11, %s136_s11 }
  0x25   :  { %s149_s28 = sld [smem:[#allocation2 + $0x80]]  ;;  %p217_p12 = scmp.lt.s32.totalorder %s211_s12, %s211_s12 }
  0x26   :  { %v55_v3 = vstv %s54_s23  ;;  %s150_s29 = sld [smem:[#allocation2 + $0x81]] }
  0x27   :  { %v56_v4 = vmul.f32 %v55_v3, %v50_v0  ;;  %v58_v5 = vstv %s146_s24  ;;  %s151_s2 = sld [smem:[#allocation2 + $0x82]]  ;;  %p218_p13 = por %p217_p12, %p216_p11 }
  0x28   :  { %v59_v6 = vmul.f32 %v58_v5, %v51_v1  ;;  %v62_v7 = vstv %s147_s25  ;;  %s152_s30 = sld [smem:[#allocation2 + $0x83]] }
  0x29   :  { %v63_v9 = vmul.f32 %v62_v7, %v52_v2  ;;  %v66_v10 = vstv %s148_s26  ;;  %s274_s4 = sld [smem:[#allocation7 + $0x1]]  ;;  %p219_p0 = pnand %p218_p13, %p212_p10 }
  0x2a   :  { %v60_v11 = vadd.f32 %v59_v6, %v56_v4  ;;  %s154_s5 = sld [smem:[#allocation2 + $0x100]]  ;;  %v67_v14 = vmul.f32 %v66_v10, %v53_v8  ;;  %v70_v25 = vstv %s272_s27 }
  0x2b   :  { %v73_v12 = vstv %s149_s28  ;;  %s155_s6 = sld [smem:[#allocation2 + $0x101]] }
  0x2c   :  { %v64_v13 = vadd.f32 %v63_v9, %v60_v11  ;;  %v74_v15 = vmul.f32 %v73_v12, %v50_v0  ;;  %v76_v16 = vstv %s150_s29  ;;  %s156_s7 = sld [smem:[#allocation2 + $0x102]] }
  0x2d   :  { %v77_v17 = vmul.f32 %v76_v16, %v51_v1  ;;  %v80_v18 = vstv %s151_s2  ;;  %s157_s8 = sld [smem:[#allocation2 + $0x103]] }
  0x2e   :  { %v81_v19 = vmul.f32 %v80_v18, %v52_v2  ;;  %v84_v20 = vstv %s152_s30  ;;  %s158_s9 = sld [smem:[#allocation7 + $0x2]]  ;;  %v68_v23 = vadd.f32 %v67_v14, %v64_v13 }
  0x2f   :  { %v78_v21 = vadd.f32 %v77_v17, %v74_v15  ;;  %v85_v22 = vmul.f32 %v84_v20, %v53_v8  ;;  %v88_v29 = vstv %s274_s4 }
  0x30   :  { %v91_v24 = vstv %s154_s5  ;;  %v71_v35 = vadd.f32 %v70_v25, %v68_v23 }
  0x31   :  { %v82_v26 = vadd.f32 %v81_v19, %v78_v21  ;;  %v92_v27 = vmul.f32 %v91_v24, %v50_v0  ;;  %v94_v28 = vstv %s155_s6 }
  0x32   :  { %v95_v30 = vmul.f32 %v94_v28, %v51_v1  ;;  %v98_v31 = vstv %s156_s7 }
  0x33   :  { %v86_v32 = vadd.f32 %v85_v22, %v82_v26  ;;  %v99_v33 = vmul.f32 %v98_v31, %v52_v2  ;;  %v102_v34 = vstv %s157_s8 }
  0x34   :  { %v96_v36 = vadd.f32 %v95_v30, %v92_v27  ;;  %v103_v37 = vmul.f32 %v102_v34, %v53_v8  ;;  %v106_v40 = vstv %s158_s9 }
  0x35   :  { %v89_v38 = vadd.f32 %v88_v29, %v86_v32 }
  0x36   :  { %v100_v39 = vadd.f32 %v99_v33, %v96_v36 }
  0x37   :  { %v108_v42 = vmax.f32 %v71_v35, %v89_v38 }
  0x38   :  { %v104_v41 = vadd.f32 %v103_v37, %v100_v39 }
  0x3a   :  { %v107_v43 = vadd.f32 %v106_v40, %v104_v41 }
  0x3c   :  { %v109_v44 = vmax.f32 %v108_v42, %v107_v43 }
  0x3e   :  { %v110_v45 = vsub.f32 %v71_v35, %v109_v44  ;;  %v113_v46 = vsub.f32 %v89_v38, %v109_v44  ;;  %v116_v47 = vsub.f32 %v107_v43, %v109_v44 }
  0x40   :  { %v111_v48 = vmul.f32 1.442695, %v110_v45  ;;  %v114_v49 = vmul.f32 1.442695, %v113_v46  ;;  %v117_v50 = vmul.f32 1.442695, %v116_v47 }
  0x42   :  { %163 = vpow2.f32 %v111_v48 }
  0x43   :  { %165 = vpow2.f32 %v114_v49 }
  0x44   :  { %167 = vpow2.f32 %v117_v50 }
  0x4f   :  { %v164_v51 = vpop.eup %163 }
  0x50   :  { %v166_v52 = vpop.eup %165 }
  0x51   :  { %v168_v53 = vpop.eup %167  ;;  %v119_v54 = vadd.f32 %v166_v52, %v164_v51 }
  0x53   :  { %v120_v55 = vadd.f32 %v168_v53, %v119_v54 }
  0x55   :  { %169 = vrcp.f32 %v120_v55 }
  0x62   :  { %v170_v56 = vpop.eup %169 }
  0x63   :  { %v122_v57 = vmul.f32 %v170_v56, %v164_v51  ;;  %v125_v58 = vmul.f32 %v170_v56, %v166_v52  ;;  %v127_v59 = vmul.f32 %v170_v56, %v168_v53 }
  0x65   :  { %124 = vst.msk [vmem:[#allocation9] sm:$0x1] %vm123_vm0, %v122_v57  ;;  %126 = vst.msk [vmem:[#allocation9 + $0x1] sm:$0x1] %vm123_vm0, %v125_v58 }
  0x66   :  { %128 = vst.msk [vmem:[#allocation9 + $0x2] sm:$0x1] %vm123_vm0, %v127_v59 }
  0x67   :  { %222 = shalt.err (!%p219_p0)
}
  0x68   :  { %138 = dma.vmem_to_hbm [thread:$0]  %s136_s11, 64, %s284_s3, [#allocation4]  }
  0x69   :  { %237 = dma.done.wait [#allocation4], 64  }
  0x6a   :  { %238 = vsyncadd [#allocation4], 4294967232 }
  0x6b   :  { %142 = vsyncpa [#allocation3], 1 }
  0x6c   :  { %143 = vsyncpa [#allocation4], 1 }
  0x6d   :  { %144 = vsyncpa [#allocation5], 1 }
  0x6e   :  { %145 = vsyncpa [#allocation6], 1 }

</bundles_post_ra>
